<compile_context>
chip_gen: v7x
topology: tpu7x:2x2x1
jax: 0.10.0
libtpu: 0.0.40
codegen_flags: <defaults>
</compile_context>

<pallas_src>
import jax
import jax.numpy as jnp
from jax.experimental import pallas as pl
from jax.experimental.pallas import tpu as pltpu


def _round_up(x, m):
    return ((x + m - 1) // m) * m


def _alpha_param_kernel(x_ref,          # (n_state_pad, TILE_B) f32, batch in lanes
                        w0_ref, b0_ref,  # (128, n_state_pad) bf16, (128, 1) f32
                        w123_ref, b123_ref,  # (3, 128, 128) bf16, (3, 128, 1) f32
                        w4_ref, b4_ref,  # (1, 128) bf16, (1, 1) f32
                        out_ref):        # (1, TILE_B) f32
    x = x_ref[...].astype(jnp.bfloat16)

    # Layer 0: n_state -> 128 (rows 64..127 are zero padding) on the MXU.
    h = jnp.dot(w0_ref[...], x, preferred_element_type=jnp.float32) + b0_ref[...]
    h = jnp.maximum(h, 0.0)

    # Layers 1..3: 128x128 dense layers on the MXU (bf16 in, f32 accumulate).
    for l in range(3):
        h = jnp.dot(w123_ref[l], h.astype(jnp.bfloat16),
                    preferred_element_type=jnp.float32) + b123_ref[l]
        h = jnp.maximum(h, 0.0)

    # Layer 4: 128 -> 1, thin MXU matvec; output stays lane-dense (1, TILE_B).
    out = jnp.dot(w4_ref[...], h.astype(jnp.bfloat16),
                  preferred_element_type=jnp.float32) + b4_ref[...]
    out_ref[...] = out.astype(out_ref.dtype)


def pack_params(params):
    """Pack logical PyTorch-layout params (w: (out, in) f32, b: (out,) f32) for the kernel."""
    (w0, b0), (w1, b1), (w2, b2), (w3, b3), (w4, b4) = params
    n_state = w0.shape[1]
    n_pad = _round_up(n_state, 8)
    # Layer 0 padded to 128 output rows / 8-multiple input cols (padding rows give
    # relu(0 + 0) = 0, so downstream layers are unaffected).
    w0p = jnp.zeros((128, n_pad), jnp.float32).at[:64, :n_state].set(w0).astype(jnp.bfloat16)
    b0p = jnp.zeros((128, 1), jnp.float32).at[:64, 0].set(b0)
    # Layer 1 input padded 64 -> 128 with zero columns; stack the three 128x128 layers.
    w1p = jnp.zeros((128, 128), jnp.float32).at[:, :64].set(w1)
    w123 = jnp.stack([w1p, w2, w3]).astype(jnp.bfloat16)          # (3, 128, 128)
    b123 = jnp.stack([b1, b2, b3])[:, :, None]                    # (3, 128, 1) f32
    w4p = w4.astype(jnp.bfloat16)                                 # (1, 128)
    b4p = b4.reshape(1, 1)                                        # (1, 1) f32
    return w0p, b0p, w123, b123, w4p, b4p


def alpha_param_forward(state, packed_params, *, tile_b=2048):
    """state: (bs, n_state) f32.  packed_params: output of pack_params().
    Returns alpha: (bs, 1) f32."""
    bs, n_state = state.shape
    w0p, b0p, w123, b123, w4p, b4p = packed_params
    n_pad = w0p.shape[1]

    # Batch tile: multiple of 128 (it is the lane dim), clamped for small batches.
    bs_lanes = _round_up(bs, 128)
    tile_b = max(128, min(_round_up(tile_b, 128), bs_lanes))
    # v7x megacore: keep at least 2 grid steps when the batch is big enough to split.
    if bs_lanes >= 2 * 128:
        tile_b = min(tile_b, _round_up((bs + 1) // 2, 128))
    bs_pad = _round_up(bs, tile_b)
    num_tiles = bs_pad // tile_b

    # Batch-in-lanes input: (n_state_pad, bs_pad).  Only the tail is padded.
    x_t = jnp.pad(state.T, ((0, n_pad - n_state), (0, bs_pad - bs)))
    # NOTE: for very large n_state, feed x_t as bf16 to halve the (only real) HBM stream.

    weights = (w0p, b0p, w123, b123, w4p, b4p)

    def const_spec(arr):
        nd = arr.ndim
        return pl.BlockSpec(arr.shape, lambda i, _nd=nd: (0,) * _nd)

    cp_kwargs = dict(dimension_semantics=("parallel",))
    if tile_b >= 8192:
        # v5e's default scoped-VMEM limit (16 MiB) is tight for very large tiles.
        cp_kwargs["vmem_limit_bytes"] = 48 * 1024 * 1024

    out = pl.pallas_call(
        _alpha_param_kernel,
        out_shape=jax.ShapeDtypeStruct((num_tiles, tile_b), jnp.float32),
        grid=(num_tiles,),
        in_specs=[pl.BlockSpec((n_pad, tile_b), lambda i: (0, i))]
        + [const_spec(a) for a in weights],
        out_specs=pl.BlockSpec((1, tile_b), lambda i: (i, 0)),
        compiler_params=pltpu.CompilerParams(**cp_kwargs),
    )(x_t, *weights)

    return out.reshape(bs_pad)[:bs].reshape(bs, 1)


def init_params(key, n_state):
    """Deterministic init; logical PyTorch Conv1d layout: w (out, in) f32, b (out,) f32."""
    dims = [(64, n_state), (128, 64), (128, 128), (128, 128), (1, 128)]
    params = []
    for fan_out, fan_in in dims:
        key, kw, kb = jax.random.split(key, 3)
        bound = 1.0 / (float(fan_in) ** 0.5)
        w = jax.random.uniform(kw, (fan_out, fan_in), jnp.float32, -bound, bound)
        b = jax.random.uniform(kb, (fan_out,), jnp.float32, -bound, bound)
        params.append((w, b))
    return params


def reference_forward(state, params):
    """Pure-JAX reference mimicking the kernel arithmetic (bf16 MXU inputs, f32 accum)."""
    h = state
    for w, b in params[:-1]:
        h = jnp.dot(h.astype(jnp.bfloat16), w.T.astype(jnp.bfloat16),
                    preferred_element_type=jnp.float32) + b
        h = jnp.maximum(h, 0.0)
    w4, b4 = params[-1]
    return jnp.dot(h.astype(jnp.bfloat16), w4.T.astype(jnp.bfloat16),
                   preferred_element_type=jnp.float32) + b4


if __name__ == "__main__":
    bs, n_state = 8, 4
    key = jax.random.PRNGKey(0)
    key, kx = jax.random.split(key)
    state = jax.random.normal(kx, (bs, n_state), jnp.float32)

    params = init_params(key, n_state)
    packed = pack_params(params)

    alpha = alpha_param_forward(state, packed)
    alpha = jax.block_until_ready(alpha)

    ref = reference_forward(state, params)
    assert alpha.shape == (bs, 1), alpha.shape
    assert jnp.allclose(alpha, ref, atol=1e-4, rtol=1e-4), (alpha, ref)

    print("KERNEL_OK")
</pallas_src>

<mosaic_0001>
module attributes {stable_mosaic.version = 11 : i64} {
  func.func @_alpha_param_kernel(%arg0: i32, %arg1: memref<8x128xf32, #tpu.memory_space<vmem>>, %arg2: memref<128x8xbf16, #tpu.memory_space<vmem>>, %arg3: memref<128x1xf32, #tpu.memory_space<vmem>>, %arg4: memref<3x128x128xbf16, #tpu.memory_space<vmem>>, %arg5: memref<3x128x1xf32, #tpu.memory_space<vmem>>, %arg6: memref<1x128xbf16, #tpu.memory_space<vmem>>, %arg7: memref<1x1xf32, #tpu.memory_space<vmem>>, %arg8: memref<1x128xf32, #tpu.memory_space<vmem>>) attributes {dimension_semantics = [#tpu.dimension_semantics<parallel>], iteration_bounds = array<i64: 1>, scalar_prefetch = 0 : i64, scratch_operands = 0 : i64, tpu.core_type = #tpu.core_type<tc>, window_params = [{transform_indices = @transform_0, window_bounds = array<i64: 8, 128>}, {pipeline_mode = #tpu.pipeline_mode<synchronous>, transform_indices = @transform_1, window_bounds = array<i64: 128, 8>}, {pipeline_mode = #tpu.pipeline_mode<synchronous>, transform_indices = @transform_2, window_bounds = array<i64: 128, 1>}, {pipeline_mode = #tpu.pipeline_mode<synchronous>, transform_indices = @transform_3, window_bounds = array<i64: 3, 128, 128>}, {pipeline_mode = #tpu.pipeline_mode<synchronous>, transform_indices = @transform_4, window_bounds = array<i64: 3, 128, 1>}, {pipeline_mode = #tpu.pipeline_mode<synchronous>, transform_indices = @transform_5, window_bounds = array<i64: 1, 128>}, {pipeline_mode = #tpu.pipeline_mode<synchronous>, transform_indices = @transform_6, window_bounds = array<i64: 1, 1>}, {transform_indices = @transform_7, window_bounds = array<i64: 1, 128>}]} {
    %c0 = arith.constant 0 : index
    %c0_0 = arith.constant 0 : index
    %0 = vector.load %arg1[%c0, %c0_0] : memref<8x128xf32, #tpu.memory_space<vmem>>, vector<8x128xf32>
    %1 = arith.truncf %0 : vector<8x128xf32> to vector<8x128xbf16>
    %c0_1 = arith.constant 0 : index
    %c0_2 = arith.constant 0 : index
    %2 = vector.load %arg2[%c0_1, %c0_2] : memref<128x8xbf16, #tpu.memory_space<vmem>>, vector<128x8xbf16>
    %cst = arith.constant dense<0.000000e+00> : vector<128x128xf32>
    %3 = tpu.matmul %2, %1, %cst {dimension_numbers = #tpu.dot_dimension_numbers<[1], [0], [0], [1], [0, 0, 1, 1], [], []>} : vector<128x8xbf16>, vector<8x128xbf16>, vector<128x128xf32> -> vector<128x128xf32>
    %c0_3 = arith.constant 0 : index
    %c0_4 = arith.constant 0 : index
    %4 = vector.load %arg3[%c0_3, %c0_4] : memref<128x1xf32, #tpu.memory_space<vmem>>, vector<128x1xf32>
    %5 = vector.broadcast %4 : vector<128x1xf32> to vector<128x128xf32>
    %6 = arith.addf %3, %5 : vector<128x128xf32>
    %cst_5 = arith.constant 0.000000e+00 : f32
    %7 = vector.broadcast %cst_5 : f32 to vector<128x128xf32>
    %8 = arith.maximumf %6, %7 : vector<128x128xf32>
    %c0_6 = arith.constant 0 : index
    %c0_7 = arith.constant 0 : index
    %c0_8 = arith.constant 0 : index
    %9 = vector.load %arg4[%c0_6, %c0_7, %c0_8] : memref<3x128x128xbf16, #tpu.memory_space<vmem>>, vector<1x128x128xbf16>
    %10 = vector.shape_cast %9 : vector<1x128x128xbf16> to vector<128x128xbf16>
    %11 = arith.truncf %8 : vector<128x128xf32> to vector<128x128xbf16>
    %cst_9 = arith.constant dense<0.000000e+00> : vector<128x128xf32>
    %12 = tpu.matmul %10, %11, %cst_9 {dimension_numbers = #tpu.dot_dimension_numbers<[1], [0], [0], [1], [0, 0, 1, 1], [], []>} : vector<128x128xbf16>, vector<128x128xbf16>, vector<128x128xf32> -> vector<128x128xf32>
    %c0_10 = arith.constant 0 : index
    %c0_11 = arith.constant 0 : index
    %c0_12 = arith.constant 0 : index
    %13 = vector.load %arg5[%c0_10, %c0_11, %c0_12] : memref<3x128x1xf32, #tpu.memory_space<vmem>>, vector<1x128x1xf32>
    %14 = vector.shape_cast %13 : vector<1x128x1xf32> to vector<128x1xf32>
    %15 = vector.broadcast %14 : vector<128x1xf32> to vector<128x128xf32>
    %16 = arith.addf %12, %15 : vector<128x128xf32>
    %cst_13 = arith.constant 0.000000e+00 : f32
    %17 = vector.broadcast %cst_13 : f32 to vector<128x128xf32>
    %18 = arith.maximumf %16, %17 : vector<128x128xf32>
    %c1 = arith.constant 1 : index
    %c0_14 = arith.constant 0 : index
    %c0_15 = arith.constant 0 : index
    %19 = vector.load %arg4[%c1, %c0_14, %c0_15] : memref<3x128x128xbf16, #tpu.memory_space<vmem>>, vector<1x128x128xbf16>
    %20 = vector.shape_cast %19 : vector<1x128x128xbf16> to vector<128x128xbf16>
    %21 = arith.truncf %18 : vector<128x128xf32> to vector<128x128xbf16>
    %cst_16 = arith.constant dense<0.000000e+00> : vector<128x128xf32>
    %22 = tpu.matmul %20, %21, %cst_16 {dimension_numbers = #tpu.dot_dimension_numbers<[1], [0], [0], [1], [0, 0, 1, 1], [], []>} : vector<128x128xbf16>, vector<128x128xbf16>, vector<128x128xf32> -> vector<128x128xf32>
    %c1_17 = arith.constant 1 : index
    %c0_18 = arith.constant 0 : index
    %c0_19 = arith.constant 0 : index
    %23 = vector.load %arg5[%c1_17, %c0_18, %c0_19] : memref<3x128x1xf32, #tpu.memory_space<vmem>>, vector<1x128x1xf32>
    %24 = vector.shape_cast %23 : vector<1x128x1xf32> to vector<128x1xf32>
    %25 = vector.broadcast %24 : vector<128x1xf32> to vector<128x128xf32>
    %26 = arith.addf %22, %25 : vector<128x128xf32>
    %cst_20 = arith.constant 0.000000e+00 : f32
    %27 = vector.broadcast %cst_20 : f32 to vector<128x128xf32>
    %28 = arith.maximumf %26, %27 : vector<128x128xf32>
    %c2 = arith.constant 2 : index
    %c0_21 = arith.constant 0 : index
    %c0_22 = arith.constant 0 : index
    %29 = vector.load %arg4[%c2, %c0_21, %c0_22] : memref<3x128x128xbf16, #tpu.memory_space<vmem>>, vector<1x128x128xbf16>
    %30 = vector.shape_cast %29 : vector<1x128x128xbf16> to vector<128x128xbf16>
    %31 = arith.truncf %28 : vector<128x128xf32> to vector<128x128xbf16>
    %cst_23 = arith.constant dense<0.000000e+00> : vector<128x128xf32>
    %32 = tpu.matmul %30, %31, %cst_23 {dimension_numbers = #tpu.dot_dimension_numbers<[1], [0], [0], [1], [0, 0, 1, 1], [], []>} : vector<128x128xbf16>, vector<128x128xbf16>, vector<128x128xf32> -> vector<128x128xf32>
    %c2_24 = arith.constant 2 : index
    %c0_25 = arith.constant 0 : index
    %c0_26 = arith.constant 0 : index
    %33 = vector.load %arg5[%c2_24, %c0_25, %c0_26] : memref<3x128x1xf32, #tpu.memory_space<vmem>>, vector<1x128x1xf32>
    %34 = vector.shape_cast %33 : vector<1x128x1xf32> to vector<128x1xf32>
    %35 = vector.broadcast %34 : vector<128x1xf32> to vector<128x128xf32>
    %36 = arith.addf %32, %35 : vector<128x128xf32>
    %cst_27 = arith.constant 0.000000e+00 : f32
    %37 = vector.broadcast %cst_27 : f32 to vector<128x128xf32>
    %38 = arith.maximumf %36, %37 : vector<128x128xf32>
    %c0_28 = arith.constant 0 : index
    %c0_29 = arith.constant 0 : index
    %39 = vector.load %arg6[%c0_28, %c0_29] : memref<1x128xbf16, #tpu.memory_space<vmem>>, vector<1x128xbf16>
    %40 = arith.truncf %38 : vector<128x128xf32> to vector<128x128xbf16>
    %cst_30 = arith.constant dense<0.000000e+00> : vector<1x128xf32>
    %41 = tpu.matmul %39, %40, %cst_30 {dimension_numbers = #tpu.dot_dimension_numbers<[1], [0], [0], [1], [0, 0, 1, 1], [], []>} : vector<1x128xbf16>, vector<128x128xbf16>, vector<1x128xf32> -> vector<1x128xf32>
    %c0_31 = arith.constant 0 : index
    %c0_32 = arith.constant 0 : index
    %42 = vector.load %arg7[%c0_31, %c0_32] : memref<1x1xf32, #tpu.memory_space<vmem>>, vector<1x1xf32>
    %43 = vector.broadcast %42 : vector<1x1xf32> to vector<1x128xf32>
    %44 = arith.addf %41, %43 : vector<1x128xf32>
    %c0_33 = arith.constant 0 : index
    %c0_34 = arith.constant 0 : index
    %45 = vector.load %arg8[%c0_33, %c0_34] : memref<1x128xf32, #tpu.memory_space<vmem>>, vector<1x128xf32>
    tpu.vector_store %arg8[%c0_33, %c0_34], %44 {strides = array<i32>} : memref<1x128xf32, #tpu.memory_space<vmem>>, vector<1x128xf32>,
    return
  }
  func.func @transform_0(%arg0: i32) -> (i32, i32) {
    %c0_i32 = arith.constant 0 : i32
    %c0_i32_0 = arith.constant 0 : i32
    return %c0_i32, %arg0 : i32, i32
  }
  func.func @transform_1(%arg0: i32) -> (i32, i32) {
    %c0_i32 = arith.constant 0 : i32
    %c0_i32_0 = arith.constant 0 : i32
    %c0_i32_1 = arith.constant 0 : i32
    return %c0_i32, %c0_i32_0 : i32, i32
  }
  func.func @transform_2(%arg0: i32) -> (i32, i32) {
    %c0_i32 = arith.constant 0 : i32
    %c0_i32_0 = arith.constant 0 : i32
    %c0_i32_1 = arith.constant 0 : i32
    return %c0_i32, %c0_i32_0 : i32, i32
  }
  func.func @transform_3(%arg0: i32) -> (i32, i32, i32) {
    %c0_i32 = arith.constant 0 : i32
    %c0_i32_0 = arith.constant 0 : i32
    %c0_i32_1 = arith.constant 0 : i32
    %c0_i32_2 = arith.constant 0 : i32
    return %c0_i32, %c0_i32_0, %c0_i32_1 : i32, i32, i32
  }
  func.func @transform_4(%arg0: i32) -> (i32, i32, i32) {
    %c0_i32 = arith.constant 0 : i32
    %c0_i32_0 = arith.constant 0 : i32
    %c0_i32_1 = arith.constant 0 : i32
    %c0_i32_2 = arith.constant 0 : i32
    return %c0_i32, %c0_i32_0, %c0_i32_1 : i32, i32, i32
  }
  func.func @transform_5(%arg0: i32) -> (i32, i32) {
    %c0_i32 = arith.constant 0 : i32
    %c0_i32_0 = arith.constant 0 : i32
    %c0_i32_1 = arith.constant 0 : i32
    return %c0_i32, %c0_i32_0 : i32, i32
  }
  func.func @transform_6(%arg0: i32) -> (i32, i32) {
    %c0_i32 = arith.constant 0 : i32
    %c0_i32_0 = arith.constant 0 : i32
    %c0_i32_1 = arith.constant 0 : i32
    return %c0_i32, %c0_i32_0 : i32, i32
  }
  func.func @transform_7(%arg0: i32) -> (i32, i32) {
    %c0_i32 = arith.constant 0 : i32
    %c0_i32_0 = arith.constant 0 : i32
    return %arg0, %c0_i32 : i32, i32
  }
}

</mosaic_0001>

<bundles_post_ra>
// kernel: tpu_custom_call.1
= control target key start
LH: loop header
LB: loop body
LE: loop exit
PB: predicated region body
PF: predicated region fallthrough
CT: control target
= control target key end

     0   :  { %s1984_s0 = inlined_call_operand.vmem [shape: f32[8,128], index: 0, kind: input, shape index: {}]   ;;  %s1985_s1 = inlined_call_operand.vmem [shape: bf16[128,8], index: 1, kind: input, shape index: {}]   ;;  %s1986_s2 = inlined_call_operand.vmem [shape: f32[128,1], index: 2, kind: input, shape index: {}]   ;;  %s1987_s3 = inlined_call_operand.vmem [shape: bf16[3,128,128], index: 3, kind: input, shape index: {}]   ;;  %s1988_s4 = inlined_call_operand.vmem [shape: f32[3,128,1], index: 4, kind: input, shape index: {}]   ;;  %s1989_s5 = inlined_call_operand.vmem [shape: bf16[1,128], index: 5, kind: input, shape index: {}]   ;;  %s1990_s6 = inlined_call_operand.<no memory space> [shape: f32[1,1], index: 6, kind: input, shape index: {}]   ;;  %s1991_s7 = inlined_call_operand.hbm [shape: f32[1,128], index: 7, kind: output, shape index: {}]  }
   0x1   :  { %v12_v0 = vstv %s1990_s6 }
   0x2   :  { %13 = vst [vmem:[#allocation2] sm:$0x1] %v12_v0 }
   0x3   :  { %v50_v1 = vld [vmem:[%s1986_s2 + $0x10] sm:$0xff]  ;;  %v48_v2 = vld [vmem:[%s1986_s2] sm:$0xff]  ;;  %vm209_vm0 = vcmask 1043456   ;;  %v1614_v4 = vmov 0   ;;  %v51_v6 = vld [vmem:[%s1986_s2 + $0x18] sm:$0xff]  ;;  %vm184_vm1 = vcmask 64512  }
   0x4   :  { %v30_v3 = vld [vmem:[%s1984_s0] sm:$0xff]  ;;  %1557 = vset.pattern.permute.xlu1 %v1614_v4  ;;  %1556 = vset.pattern.permute.xlu0 %v1614_v4  ;;  %v49_v9 = vld [vmem:[%s1986_s2 + $0x8] sm:$0xff]  ;;  %v1560_v11 = vld [vmem:[%s1985_s1 + $0x10] sm:$0xff]  }
   0x5   :  { %v31_v5 = vpack.c.bf16 %v30_v3, %v30_v3  ;;  %76 = vperm.xlu1 %1557, %v50_v1   ;;  %66 = vperm.xlu0 %1556, %v48_v2   ;;  %v1558_v7 = vld [vmem:[%s1985_s1] sm:$0xff]   ;;  %v1559_v10 = vld [vmem:[%s1985_s1 + $0x8] sm:$0xff]   ;;  %v55_v14 = vld [vmem:[%s1986_s2 + $0x38] sm:$0xff] }
   0x6   :  { %1419 = vmatprep.mubr.msk.bf16.mxu0 %vm184_vm1, %v1558_v7  ;;  %v53_v12 = vld [vmem:[%s1986_s2 + $0x28] sm:$0xff]  ;;  %v52_v13 = vld [vmem:[%s1986_s2 + $0x20] sm:$0xff]  ;;  %v54_v15 = vld [vmem:[%s1986_s2 + $0x30] sm:$0xff] }
   0x7   :  { %1551 = vmatprep.subr.msk.bf16.mxu0 %vm209_vm0, %v31_v5  ;;  %v211_v8 = vsel %vm209_vm0, %v31_v5, 0  ;;  %v1561_v16 = vld [vmem:[%s1985_s1 + $0x18] sm:$0xff]   ;;  %v1562_v17 = vld [vmem:[%s1985_s1 + $0x20] sm:$0xff]   ;;  %v57_v18 = vld [vmem:[%s1986_s2 + $0x48] sm:$0xff] }
   0x8   :  { %1418 = vmatpush3.bf16.msra.mxu0 %v211_v8  ;;  %v56_v19 = vld [vmem:[%s1986_s2 + $0x40] sm:$0xff]  ;;  %v59_v20 = vld [vmem:[%s1986_s2 + $0x58] sm:$0xff]  ;;  %v58_v21 = vld [vmem:[%s1986_s2 + $0x50] sm:$0xff] }
   0x9   :  { %81 = vperm.xlu1 %1557, %v51_v6   ;;  %71 = vperm.xlu0 %1556, %v49_v9   ;;  %v1563_v22 = vld [vmem:[%s1985_s1 + $0x28] sm:$0xff]   ;;  %v1564_v23 = vld [vmem:[%s1985_s1 + $0x30] sm:$0xff]   ;;  %v60_v25 = vld [vmem:[%s1986_s2 + $0x60] sm:$0xff] }
   0xa   :  { %v61_v24 = vld [vmem:[%s1986_s2 + $0x68] sm:$0xff]  ;;  %v63_v26 = vld [vmem:[%s1986_s2 + $0x78] sm:$0xff]  ;;  %v62_v27 = vld [vmem:[%s1986_s2 + $0x70] sm:$0xff] }
   0xb   :  { %1420 = vmatmul.mubr.msk.bf16.vlgmr.msra.gmra.mrb[0].mxu0 %vm184_vm1, %v1559_v10  ;;  %v1565_v28 = vld [vmem:[%s1985_s1 + $0x38] sm:$0xff]   ;;  %v351_v29 = vld [vmem:[%s1988_s4 + $0x8] sm:$0xff]  ;;  %v350_v30 = vld [vmem:[%s1988_s4] sm:$0xff] }
   0xc   :  { %1423 = vmatprep.mubr.msk.bf16.mxu0 %vm184_vm1, %v1560_v11  ;;  %v353_v31 = vld [vmem:[%s1988_s4 + $0x18] sm:$0xff]  ;;  %v352_v32 = vld [vmem:[%s1988_s4 + $0x10] sm:$0xff]  ;;  %v355_v33 = vld [vmem:[%s1988_s4 + $0x28] sm:$0xff] }
   0xd   :  { %91 = vperm.xlu1 %1557, %v53_v12   ;;  %86 = vperm.xlu0 %1556, %v52_v13   ;;  %v354_v34 = vld [vmem:[%s1988_s4 + $0x20] sm:$0xff]  ;;  %v357_v35 = vld [vmem:[%s1988_s4 + $0x38] sm:$0xff]  ;;  %v356_v36 = vld [vmem:[%s1988_s4 + $0x30] sm:$0xff] }
  0x11   :  { %101 = vperm.xlu1 %1557, %v55_v14   ;;  %96 = vperm.xlu0 %1556, %v54_v15  }
  0x13   :  { %1424 = vmatmul.mubr.msk.bf16.gmra.mrb[4].mxu0 %vm184_vm1, %v1561_v16 }
  0x14   :  { %1427 = vmatprep.mubr.msk.bf16.mxu0 %vm184_vm1, %v1562_v17 }
  0x15   :  { %111 = vperm.xlu1 %1557, %v57_v18   ;;  %106 = vperm.xlu0 %1556, %v56_v19  }
  0x19   :  { %121 = vperm.xlu1 %1557, %v59_v20   ;;  %116 = vperm.xlu0 %1556, %v58_v21  }
  0x1b   :  { %1428 = vmatmul.mubr.msk.bf16.gmra.mrb[8].mxu0 %vm184_vm1, %v1563_v22 }
  0x1c   :  { %1431 = vmatprep.mubr.msk.bf16.mxu0 %vm184_vm1, %v1564_v23 }
  0x1d   :  { %131 = vperm.xlu1 %1557, %v61_v24   ;;  %126 = vperm.xlu0 %1556, %v60_v25  }
  0x21   :  { %141 = vperm.xlu1 %1557, %v63_v26   ;;  %136 = vperm.xlu0 %1556, %v62_v27  }
  0x23   :  { %1432 = vmatmul.mubr.msk.bf16.gmra.mrb[12].mxu0 %vm184_vm1, %v1565_v28 }
  0x25   :  { %373 = vperm.xlu1 %1557, %v351_v29   ;;  %368 = vperm.xlu0 %1556, %v350_v30  }
  0x29   :  { %383 = vperm.xlu1 %1557, %v353_v31   ;;  %378 = vperm.xlu0 %1556, %v352_v32  }
  0x2d   :  { %393 = vperm.xlu1 %1557, %v355_v33   ;;  %388 = vperm.xlu0 %1556, %v354_v34  }
  0x31   :  { %403 = vperm.xlu1 %1557, %v357_v35   ;;  %398 = vperm.xlu0 %1556, %v356_v36  }
  0x32   :  { %14 = vsyncpa [#allocation4], 0  ;;  %v359_v37 = vld [vmem:[%s1988_s4 + $0x48] sm:$0xff]  ;;  %v358_v38 = vld [vmem:[%s1988_s4 + $0x40] sm:$0xff]  ;;  %vm1616_vm2 = vmmov 0   ;;  %s1617_s1 = smov [#allocation3]  }
  0x33   :  { %v361_v39 = vld [vmem:[%s1988_s4 + $0x58] sm:$0xff]  ;;  %v360_v40 = vld [vmem:[%s1988_s4 + $0x50] sm:$0xff]  ;;  %v363_v41 = vld [vmem:[%s1988_s4 + $0x68] sm:$0xff]  ;;  %s1239_s6 = sshll.u32 %s1617_s1, 4  ;;  %s1240_s6 = int_to_ptr.vmem [resolvable:$true] %s1239_s6 }
  0x34   :  { %v362_v42 = vld [vmem:[%s1988_s4 + $0x60] sm:$0xff]  ;;  %v365_v43 = vld [vmem:[%s1988_s4 + $0x78] sm:$0xff]  ;;  %v364_v44 = vld [vmem:[%s1988_s4 + $0x70] sm:$0xff]  ;;  %s1590_s10 = scalar_lea.vmem %s1240_s6, 16  ;;  %s1594_s11 = scalar_lea.vmem %s1240_s6, 32 }
  0x35   :  { %413 = vperm.xlu1 %1557, %v359_v37   ;;  %408 = vperm.xlu0 %1556, %v358_v38   ;;  %v1288_v45 = vld [vmem:[%s1988_s4 + $0x88] sm:$0xff]  ;;  %v1287_v46 = vld [vmem:[%s1988_s4 + $0x80] sm:$0xff]  ;;  %v1290_v47 = vld [vmem:[%s1988_s4 + $0x98] sm:$0xff]  ;;  %p1591_p0 = scmp.ne.s32.totalorder %s1240_s6, %s1590_s10  ;;  %p1595_p1 = scmp.lt.s32.totalorder %s1240_s6, %s1240_s6 }
  0x36   :  { %v1289_v48 = vld [vmem:[%s1988_s4 + $0x90] sm:$0xff]  ;;  %v1292_v49 = vld [vmem:[%s1988_s4 + $0xa8] sm:$0xff]  ;;  %v1291_v50 = vld [vmem:[%s1988_s4 + $0xa0] sm:$0xff]  ;;  %p1596_p2 = scmp.lt.s32.totalorder %s1594_s11, %s1590_s10 }
  0x37   :  { %v1294_v51 = vld [vmem:[%s1988_s4 + $0xb8] sm:$0xff]  ;;  %v1293_v52 = vld [vmem:[%s1988_s4 + $0xb0] sm:$0xff]  ;;  %v1296_v53 = vld [vmem:[%s1988_s4 + $0xc8] sm:$0xff] }
  0x38   :  { %v1295_v54 = vld [vmem:[%s1988_s4 + $0xc0] sm:$0xff]  ;;  %v1298_v55 = vld [vmem:[%s1988_s4 + $0xd8] sm:$0xff]  ;;  %v1297_v56 = vld [vmem:[%s1988_s4 + $0xd0] sm:$0xff]  ;;  %p1597_p3 = por %p1596_p2, %p1595_p1 }
  0x39   :  { %423 = vperm.xlu1 %1557, %v361_v39   ;;  %418 = vperm.xlu0 %1556, %v360_v40   ;;  %v1300_v57 = vld [vmem:[%s1988_s4 + $0xe8] sm:$0xff]  ;;  %v1299_v58 = vld [vmem:[%s1988_s4 + $0xe0] sm:$0xff]  ;;  %v1302_v59 = vld [vmem:[%s1988_s4 + $0xf8] sm:$0xff] }
  0x3a   :  { %v1301_v60 = vld [vmem:[%s1988_s4 + $0xf0] sm:$0xff]  ;;  %v1328_v61 = vld [vmem:[%s1988_s4 + $0x108] sm:$0xff]  ;;  %v1327_v62 = vld [vmem:[%s1988_s4 + $0x100] sm:$0xff]  ;;  %p1598_p4 = pnand %p1597_p3, %p1591_p0 }
  0x3b   :  { %v1330_v63 = vld [vmem:[%s1988_s4 + $0x118] sm:$0xff]  ;;  %v1329_v0 = vld [vmem:[%s1988_s4 + $0x110] sm:$0xff]  ;;  %v1332_v1 = vld [vmem:[%s1988_s4 + $0x128] sm:$0xff] }
  0x3c   :  { %v1331_v2 = vld [vmem:[%s1988_s4 + $0x120] sm:$0xff]  ;;  %v1334_v3 = vld [vmem:[%s1988_s4 + $0x138] sm:$0xff]  ;;  %v1333_v4 = vld [vmem:[%s1988_s4 + $0x130] sm:$0xff] }
  0x3d   :  { %433 = vperm.xlu1 %1557, %v363_v41   ;;  %428 = vperm.xlu0 %1556, %v362_v42   ;;  %v1336_v5 = vld [vmem:[%s1988_s4 + $0x148] sm:$0xff]  ;;  %v1335_v6 = vld [vmem:[%s1988_s4 + $0x140] sm:$0xff]  ;;  %v1338_v7 = vld [vmem:[%s1988_s4 + $0x158] sm:$0xff] }
  0x3e   :  { %v1337_v8 = vld [vmem:[%s1988_s4 + $0x150] sm:$0xff]  ;;  %v1340_v9 = vld [vmem:[%s1988_s4 + $0x168] sm:$0xff]  ;;  %v1339_v10 = vld [vmem:[%s1988_s4 + $0x160] sm:$0xff] }
  0x3f   :  { %v1342_v11 = vld [vmem:[%s1988_s4 + $0x178] sm:$0xff]  ;;  %v1341_v12 = vld [vmem:[%s1988_s4 + $0x170] sm:$0xff]  ;;  %v1182_v13 = vld [vmem:[#allocation2] sm:$0x1] }
  0x40   :  { %v1566_v14 = vld [vmem:[%s1987_s3] sm:$0xff]  }
  0x41   :  { %443 = vperm.xlu1 %1557, %v365_v43   ;;  %438 = vperm.xlu0 %1556, %v364_v44  }
  0x42   :  { %1451 = vmatprep.mubr.bf16.mxu1 %v1566_v14 }
  0x45   :  { %656 = vperm.xlu1 %1557, %v1288_v45   ;;  %651 = vperm.xlu0 %1556, %v1287_v46  }
  0x49   :  { %666 = vperm.xlu1 %1557, %v1290_v47   ;;  %661 = vperm.xlu0 %1556, %v1289_v48  }
  0x4d   :  { %676 = vperm.xlu1 %1557, %v1292_v49   ;;  %671 = vperm.xlu0 %1556, %v1291_v50  }
  0x51   :  { %686 = vperm.xlu1 %1557, %v1294_v51   ;;  %681 = vperm.xlu0 %1556, %v1293_v52  }
  0x55   :  { %696 = vperm.xlu1 %1557, %v1296_v53   ;;  %691 = vperm.xlu0 %1556, %v1295_v54  }
  0x59   :  { %706 = vperm.xlu1 %1557, %v1298_v55   ;;  %701 = vperm.xlu0 %1556, %v1297_v56  }
  0x5d   :  { %716 = vperm.xlu1 %1557, %v1300_v57   ;;  %711 = vperm.xlu0 %1556, %v1299_v58  }
  0x61   :  { %726 = vperm.xlu1 %1557, %v1302_v59   ;;  %721 = vperm.xlu0 %1556, %v1301_v60  }
  0x65   :  { %939 = vperm.xlu1 %1557, %v1328_v61   ;;  %934 = vperm.xlu0 %1556, %v1327_v62  }
  0x69   :  { %949 = vperm.xlu1 %1557, %v1330_v63   ;;  %944 = vperm.xlu0 %1556, %v1329_v0  }
  0x6d   :  { %959 = vperm.xlu1 %1557, %v1332_v1   ;;  %954 = vperm.xlu0 %1556, %v1331_v2  }
  0x71   :  { %969 = vperm.xlu1 %1557, %v1334_v3   ;;  %964 = vperm.xlu0 %1556, %v1333_v4  }
  0x75   :  { %979 = vperm.xlu1 %1557, %v1336_v5   ;;  %974 = vperm.xlu0 %1556, %v1335_v6  }
  0x79   :  { %989 = vperm.xlu1 %1557, %v1338_v7   ;;  %984 = vperm.xlu0 %1556, %v1337_v8  }
  0x7d   :  { %999 = vperm.xlu1 %1557, %v1340_v9   ;;  %994 = vperm.xlu0 %1556, %v1339_v10  }
  0x81   :  { %1009 = vperm.xlu1 %1557, %v1342_v11   ;;  %1004 = vperm.xlu0 %1556, %v1341_v12  }
  0x84   :  { %v67_v15 = vpop.permute.xlu0 %66  ;;  %v77_v16 = vpop.permute.xlu1 %76 }
  0x85   :  { %1185 = vperm.xlu0 %1556, %v1182_v13  }
  0x88   :  { %v72_v17 = vpop.permute.xlu0 %71  ;;  %v82_v18 = vpop.permute.xlu1 %81 }
  0x8c   :  { %v87_v19 = vpop.permute.xlu0 %86  ;;  %v92_v20 = vpop.permute.xlu1 %91 }
  0x90   :  { %v97_v21 = vpop.permute.xlu0 %96  ;;  %v102_v25 = vpop.permute.xlu1 %101 }
  0x94   :  { %v107_v33 = vpop.permute.xlu0 %106  ;;  %v112_v37 = vpop.permute.xlu1 %111 }
  0x98   :  { %v117_v45 = vpop.permute.xlu0 %116  ;;  %v122_v50 = vpop.permute.xlu1 %121 }
  0x9c   :  { %v127_v58 = vpop.permute.xlu0 %126  ;;  %v132_v62 = vpop.permute.xlu1 %131 }
  0xa0   :  { %v137_v6 = vpop.permute.xlu0 %136  ;;  %v142_v11 = vpop.permute.xlu1 %141 }
  0xde   :  { %v1421_v22 = vpop.f32.mrb[0].mxu0 }
  0xdf   :  { %v256_v23 = vadd.f32 %v1421_v22, %v77_v16  ;;  %v247_v24 = vpop.f32.mrb[1].mxu0 }
  0xe0   :  { %v1422_v26 = vpop.f32.mrb[2].mxu0  ;;  %v248_v27 = vadd.f32 %v247_v24, %v67_v15  ;;  %v1568_v24 = vld [vmem:[%s1987_s3 + $0x10] sm:$0xff]  }
  0xe1   :  { %v259_v28 = vadd.f32 %v1422_v26, %v82_v18  ;;  %v250_v29 = vpop.f32.mrb[3].mxu0  ;;  %v312_v30 = vmax.f32 %v256_v23, 0.0  ;;  %v1567_v23 = vld [vmem:[%s1987_s3 + $0x8] sm:$0xff]   ;;  %v1570_v26 = vld [vmem:[%s1987_s3 + $0x20] sm:$0xff]  }
  0xe2   :  { %v251_v32 = vadd.f32 %v250_v29, %v72_v17  ;;  %v310_v34 = vmax.f32 %v248_v27, 0.0  ;;  %v1571_v27 = vld [vmem:[%s1987_s3 + $0x28] sm:$0xff]   ;;  %v1573_v29 = vld [vmem:[%s1987_s3 + $0x38] sm:$0xff]  }
  0xe3   :  { %v313_v31 = vmax.f32 %v259_v28, 0.0  ;;  %v1572_v28 = vld [vmem:[%s1987_s3 + $0x30] sm:$0xff]  }
  0xe4   :  { %v311_v36 = vmax.f32 %v251_v32, 0.0  ;;  %v374_v32 = vpop.permute.xlu1 %373 }
  0xe5   :  { %v343_v35 = vpack.c.bf16 %v313_v31, %v312_v30  ;;  %v1574_v30 = vld [vmem:[%s1987_s3 + $0x40] sm:$0xff]   ;;  %v369_v31 = vpop.permute.xlu0 %368 }
  0xe6   :  { %v1425_v38 = vpop.f32.mrb[4].mxu0  ;;  %v342_v41 = vpack.c.bf16 %v311_v36, %v310_v34  ;;  %1483 = vmatprep.mubr.bf16.mxu0 %v1574_v30 }
  0xe7   :  { %v272_v39 = vadd.f32 %v1425_v38, %v97_v21  ;;  %v263_v40 = vpop.f32.mrb[5].mxu0 }
  0xe8   :  { %v1426_v42 = vpop.f32.mrb[6].mxu0  ;;  %v264_v43 = vadd.f32 %v263_v40, %v87_v19  ;;  %1435 = vmatprep.subr.bf16.mxu1 %v342_v41  ;;  %v384_v34 = vpop.permute.xlu1 %383 }
  0xe9   :  { %v275_v44 = vadd.f32 %v1426_v42, %v102_v25  ;;  %v266_v46 = vpop.f32.mrb[7].mxu0  ;;  %1436 = vmatpush3.bf16.msra.mxu1 %v342_v41  ;;  %v316_v47 = vmax.f32 %v272_v39, 0.0  ;;  %v1569_v25 = vld [vmem:[%s1987_s3 + $0x18] sm:$0xff]  }
  0xea   :  { %v267_v49 = vadd.f32 %v266_v46, %v92_v20  ;;  %1437 = vmatprep.subr.bf16.mxu1 %v343_v35  ;;  %v314_v51 = vmax.f32 %v264_v43, 0.0 }
  0xeb   :  { %v317_v48 = vmax.f32 %v275_v44, 0.0 }
  0xec   :  { %v315_v53 = vmax.f32 %v267_v49, 0.0  ;;  %v394_v36 = vpop.permute.xlu1 %393 }
  0xed   :  { %v345_v52 = vpack.c.bf16 %v317_v48, %v316_v47  ;;  %1438 = vmatpush3.bf16.msra.mxu1 %v343_v35 }
  0xee   :  { %v1429_v54 = vpop.f32.mrb[8].mxu0  ;;  %v344_v55 = vpack.c.bf16 %v315_v53, %v314_v51 }
  0xef   :  { %v288_v56 = vadd.f32 %v1429_v54, %v117_v45  ;;  %v279_v57 = vpop.f32.mrb[9].mxu0 }
  0xf0   :  { %v1430_v59 = vpop.f32.mrb[10].mxu0  ;;  %v280_v60 = vadd.f32 %v279_v57, %v107_v33  ;;  %1439 = vmatprep.subr.bf16.mxu1 %v344_v55  ;;  %v379_v33 = vpop.permute.xlu0 %378 }
  0xf1   :  { %v291_v61 = vadd.f32 %v1430_v59, %v122_v50  ;;  %v282_v63 = vpop.f32.mrb[11].mxu0  ;;  %1440 = vmatpush3.bf16.msra.mxu1 %v344_v55  ;;  %v320_v0 = vmax.f32 %v288_v56, 0.0  ;;  %v404_v41 = vpop.permute.xlu1 %403 }
  0xf2   :  { %v283_v2 = vadd.f32 %v282_v63, %v112_v37  ;;  %1441 = vmatprep.subr.bf16.mxu1 %v345_v52  ;;  %v318_v3 = vmax.f32 %v280_v60, 0.0 }
  0xf3   :  { %v321_v1 = vmax.f32 %v291_v61, 0.0 }
  0xf4   :  { %v319_v5 = vmax.f32 %v283_v2, 0.0  ;;  %v389_v35 = vpop.permute.xlu0 %388 }
  0xf5   :  { %v347_v4 = vpack.c.bf16 %v321_v1, %v320_v0  ;;  %1442 = vmatpush3.bf16.msra.mxu1 %v345_v52  ;;  %v414_v53 = vpop.permute.xlu1 %413 }
  0xf6   :  { %v1433_v7 = vpop.f32.mrb[12].mxu0  ;;  %v346_v8 = vpack.c.bf16 %v319_v5, %v318_v3 }
  0xf7   :  { %v304_v9 = vadd.f32 %v1433_v7, %v137_v6  ;;  %v295_v10 = vpop.f32.mrb[13].mxu0 }
  0xf8   :  { %v1434_v12 = vpop.f32.mrb[14].mxu0  ;;  %v296_v13 = vadd.f32 %v295_v10, %v127_v58  ;;  %1443 = vmatprep.subr.bf16.mxu1 %v346_v8  ;;  %v399_v37 = vpop.permute.xlu0 %398 }
  0xf9   :  { %v307_v14 = vadd.f32 %v1434_v12, %v142_v11  ;;  %v298_v15 = vpop.f32.mrb[15].mxu0  ;;  %1444 = vmatpush3.bf16.msra.mxu1 %v346_v8  ;;  %v324_v16 = vmax.f32 %v304_v9, 0.0  ;;  %v424_v2 = vpop.permute.xlu1 %423 }
  0xfa   :  { %v299_v18 = vadd.f32 %v298_v15, %v132_v62  ;;  %1445 = vmatprep.subr.bf16.mxu1 %v347_v4  ;;  %v322_v19 = vmax.f32 %v296_v13, 0.0 }
  0xfb   :  { %v325_v17 = vmax.f32 %v307_v14, 0.0 }
  0xfc   :  { %v323_v21 = vmax.f32 %v299_v18, 0.0  ;;  %v409_v49 = vpop.permute.xlu0 %408 }
  0xfd   :  { %v349_v20 = vpack.c.bf16 %v325_v17, %v324_v16  ;;  %1446 = vmatpush3.bf16.msra.mxu1 %v347_v4  ;;  %v434_v15 = vpop.permute.xlu1 %433 }
  0xfe   :  { %v348_v22 = vpack.c.bf16 %v323_v21, %v322_v19 }
 0x100   :  { %1447 = vmatprep.subr.bf16.mxu1 %v348_v22  ;;  %v419_v62 = vpop.permute.xlu0 %418 }
 0x101   :  { %1448 = vmatpush3.bf16.msra.mxu1 %v348_v22 }
 0x102   :  { %1449 = vmatprep.subr.bf16.mxu1 %v349_v20 }
 0x104   :  { %v429_v10 = vpop.permute.xlu0 %428 }
 0x105   :  { %1450 = vmatpush3.bf16.msra.mxu1 %v349_v20 }
 0x108   :  { %1452 = vmatmul.mubr.bf16.vlgmr.msra.gmra.mrb[0].mxu1 %v1567_v23  ;;  %v439_v22 = vpop.permute.xlu0 %438 }
 0x109   :  { %1455 = vmatprep.mubr.bf16.mxu1 %v1568_v24 }
 0x110   :  { %1456 = vmatmul.mubr.bf16.gmra.mrb[4].mxu1 %v1569_v25 }
 0x111   :  { %1459 = vmatprep.mubr.bf16.mxu1 %v1570_v26 }
 0x118   :  { %1460 = vmatmul.mubr.bf16.gmra.mrb[8].mxu1 %v1571_v27  ;;  %v444_v27 = vpop.permute.xlu1 %443 }
 0x119   :  { %1463 = vmatprep.mubr.bf16.mxu1 %v1572_v28 }
 0x120   :  { %1464 = vmatmul.mubr.bf16.gmra.mrb[12].mxu1 %v1573_v29 }
 0x1db   :  { %v1453_v38 = vpop.f32.mrb[0].mxu1 }
 0x1dc   :  { %v537_v39 = vadd.f32 %v1453_v38, %v379_v33  ;;  %v528_v40 = vpop.f32.mrb[1].mxu1 }
 0x1dd   :  { %v529_v42 = vadd.f32 %v528_v40, %v369_v31  ;;  %v1454_v43 = vpop.f32.mrb[2].mxu1  ;;  %v1576_v40 = vld [vmem:[%s1987_s3 + $0x50] sm:$0xff]  }
 0x1de   :  { %v540_v44 = vadd.f32 %v1454_v43, %v384_v34  ;;  %v531_v45 = vpop.f32.mrb[3].mxu1  ;;  %v593_v47 = vmax.f32 %v537_v39, 0.0  ;;  %v1575_v39 = vld [vmem:[%s1987_s3 + $0x48] sm:$0xff]  }
 0x1df   :  { %v532_v46 = vadd.f32 %v531_v45, %v374_v32  ;;  %v591_v50 = vmax.f32 %v529_v42, 0.0  ;;  %v1578_v42 = vld [vmem:[%s1987_s3 + $0x60] sm:$0xff]   ;;  %v1579_v43 = vld [vmem:[%s1987_s3 + $0x68] sm:$0xff]   ;;  %v1581_v45 = vld [vmem:[%s1987_s3 + $0x78] sm:$0xff]  }
 0x1e0   :  { %v594_v48 = vmax.f32 %v540_v44, 0.0  ;;  %v1580_v44 = vld [vmem:[%s1987_s3 + $0x70] sm:$0xff]  }
 0x1e1   :  { %v592_v51 = vmax.f32 %v532_v46, 0.0  ;;  %v1582_v46 = vld [vmem:[%s1987_s3 + $0x80] sm:$0xff]  }
 0x1e2   :  { %v625_v52 = vpack.c.bf16 %v594_v48, %v593_v47  ;;  %1515 = vmatprep.mubr.bf16.mxu1 %v1582_v46  ;;  %v652_v47 = vpop.permute.xlu0 %651  ;;  %v657_v48 = vpop.permute.xlu1 %656 }
 0x1e3   :  { %v624_v54 = vpack.c.bf16 %v592_v51, %v591_v50  ;;  %v1457_v55 = vpop.f32.mrb[4].mxu1 }
 0x1e4   :  { %v553_v56 = vadd.f32 %v1457_v55, %v399_v37  ;;  %v544_v57 = vpop.f32.mrb[5].mxu1 }
 0x1e5   :  { %v545_v58 = vadd.f32 %v544_v57, %v389_v35  ;;  %v1458_v59 = vpop.f32.mrb[6].mxu1  ;;  %1467 = vmatprep.subr.bf16.mxu0 %v624_v54 }
 0x1e6   :  { %v556_v60 = vadd.f32 %v1458_v59, %v404_v41  ;;  %v547_v61 = vpop.f32.mrb[7].mxu1  ;;  %1468 = vmatpush3.bf16.msra.mxu0 %v624_v54  ;;  %v597_v0 = vmax.f32 %v553_v56, 0.0  ;;  %v1577_v41 = vld [vmem:[%s1987_s3 + $0x58] sm:$0xff]   ;;  %v667_v50 = vpop.permute.xlu1 %666 }
 0x1e7   :  { %v548_v63 = vadd.f32 %v547_v61, %v394_v36  ;;  %1469 = vmatprep.subr.bf16.mxu0 %v625_v52  ;;  %v595_v3 = vmax.f32 %v545_v58, 0.0 }
 0x1e8   :  { %v598_v1 = vmax.f32 %v556_v60, 0.0 }
 0x1e9   :  { %v596_v4 = vmax.f32 %v548_v63, 0.0 }
 0x1ea   :  { %v627_v5 = vpack.c.bf16 %v598_v1, %v597_v0  ;;  %1470 = vmatpush3.bf16.msra.mxu0 %v625_v52  ;;  %v677_v52 = vpop.permute.xlu1 %676 }
 0x1eb   :  { %v626_v6 = vpack.c.bf16 %v596_v4, %v595_v3  ;;  %v1461_v7 = vpop.f32.mrb[8].mxu1 }
 0x1ec   :  { %v569_v8 = vadd.f32 %v1461_v7, %v419_v62  ;;  %v560_v9 = vpop.f32.mrb[9].mxu1 }
 0x1ed   :  { %v561_v11 = vadd.f32 %v560_v9, %v409_v49  ;;  %v1462_v12 = vpop.f32.mrb[10].mxu1  ;;  %1471 = vmatprep.subr.bf16.mxu0 %v626_v6  ;;  %v662_v49 = vpop.permute.xlu0 %661 }
 0x1ee   :  { %v572_v13 = vadd.f32 %v1462_v12, %v424_v2  ;;  %v563_v14 = vpop.f32.mrb[11].mxu1  ;;  %1472 = vmatpush3.bf16.msra.mxu0 %v626_v6  ;;  %v601_v17 = vmax.f32 %v569_v8, 0.0  ;;  %v687_v57 = vpop.permute.xlu1 %686 }
 0x1ef   :  { %v564_v16 = vadd.f32 %v563_v14, %v414_v53  ;;  %1473 = vmatprep.subr.bf16.mxu0 %v627_v5  ;;  %v599_v19 = vmax.f32 %v561_v11, 0.0 }
 0x1f0   :  { %v602_v18 = vmax.f32 %v572_v13, 0.0 }
 0x1f1   :  { %v600_v20 = vmax.f32 %v564_v16, 0.0  ;;  %v672_v51 = vpop.permute.xlu0 %671 }
 0x1f2   :  { %v629_v21 = vpack.c.bf16 %v602_v18, %v601_v17  ;;  %1474 = vmatpush3.bf16.msra.mxu0 %v627_v5  ;;  %v697_v5 = vpop.permute.xlu1 %696 }
 0x1f3   :  { %v628_v23 = vpack.c.bf16 %v600_v20, %v599_v19  ;;  %v1465_v24 = vpop.f32.mrb[12].mxu1 }
 0x1f4   :  { %v585_v25 = vadd.f32 %v1465_v24, %v439_v22  ;;  %v576_v26 = vpop.f32.mrb[13].mxu1 }
 0x1f5   :  { %v577_v28 = vadd.f32 %v576_v26, %v429_v10  ;;  %v1466_v29 = vpop.f32.mrb[14].mxu1  ;;  %1475 = vmatprep.subr.bf16.mxu0 %v628_v23  ;;  %v682_v53 = vpop.permute.xlu0 %681 }
 0x1f6   :  { %v588_v30 = vadd.f32 %v1466_v29, %v444_v27  ;;  %v579_v31 = vpop.f32.mrb[15].mxu1  ;;  %1476 = vmatpush3.bf16.msra.mxu0 %v628_v23  ;;  %v605_v33 = vmax.f32 %v585_v25, 0.0  ;;  %v707_v18 = vpop.permute.xlu1 %706 }
 0x1f7   :  { %v580_v32 = vadd.f32 %v579_v31, %v434_v15  ;;  %1477 = vmatprep.subr.bf16.mxu0 %v629_v21  ;;  %v603_v35 = vmax.f32 %v577_v28, 0.0 }
 0x1f8   :  { %v606_v34 = vmax.f32 %v588_v30, 0.0 }
 0x1f9   :  { %v604_v36 = vmax.f32 %v580_v32, 0.0  ;;  %v692_v1 = vpop.permute.xlu0 %691 }
 0x1fa   :  { %v631_v37 = vpack.c.bf16 %v606_v34, %v605_v33  ;;  %1478 = vmatpush3.bf16.msra.mxu0 %v629_v21  ;;  %v717_v31 = vpop.permute.xlu1 %716 }
 0x1fb   :  { %v630_v38 = vpack.c.bf16 %v604_v36, %v603_v35 }
 0x1fd   :  { %1479 = vmatprep.subr.bf16.mxu0 %v630_v38  ;;  %v702_v14 = vpop.permute.xlu0 %701 }
 0x1fe   :  { %1480 = vmatpush3.bf16.msra.mxu0 %v630_v38 }
 0x1ff   :  { %1481 = vmatprep.subr.bf16.mxu0 %v631_v37 }
 0x201   :  { %v712_v26 = vpop.permute.xlu0 %711 }
 0x202   :  { %1482 = vmatpush3.bf16.msra.mxu0 %v631_v37 }
 0x205   :  { %1484 = vmatmul.mubr.bf16.vlgmr.msra.gmra.mrb[16].mxu0 %v1575_v39  ;;  %v722_v38 = vpop.permute.xlu0 %721 }
 0x206   :  { %1487 = vmatprep.mubr.bf16.mxu0 %v1576_v40 }
 0x20d   :  { %1488 = vmatmul.mubr.bf16.gmra.mrb[20].mxu0 %v1577_v41 }
 0x20e   :  { %1491 = vmatprep.mubr.bf16.mxu0 %v1578_v42 }
 0x215   :  { %1492 = vmatmul.mubr.bf16.gmra.mrb[24].mxu0 %v1579_v43  ;;  %v727_v43 = vpop.permute.xlu1 %726 }
 0x216   :  { %1495 = vmatprep.mubr.bf16.mxu0 %v1580_v44 }
 0x21d   :  { %1496 = vmatmul.mubr.bf16.gmra.mrb[28].mxu0 %v1581_v45 }
 0x2d8   :  { %v1485_v54 = vpop.f32.mrb[16].mxu0 }
 0x2d9   :  { %v820_v55 = vadd.f32 %v1485_v54, %v662_v49  ;;  %v811_v56 = vpop.f32.mrb[17].mxu0 }
 0x2da   :  { %v812_v58 = vadd.f32 %v811_v56, %v652_v47  ;;  %v1486_v59 = vpop.f32.mrb[18].mxu0  ;;  %v1584_v56 = vld [vmem:[%s1987_s3 + $0x90] sm:$0xff]  }
 0x2db   :  { %v823_v60 = vadd.f32 %v1486_v59, %v667_v50  ;;  %v814_v61 = vpop.f32.mrb[19].mxu0  ;;  %v876_v63 = vmax.f32 %v820_v55, 0.0  ;;  %v1583_v55 = vld [vmem:[%s1987_s3 + $0x88] sm:$0xff]  }
 0x2dc   :  { %v815_v62 = vadd.f32 %v814_v61, %v657_v48  ;;  %v874_v2 = vmax.f32 %v812_v58, 0.0  ;;  %v1586_v58 = vld [vmem:[%s1987_s3 + $0xa0] sm:$0xff]   ;;  %v1587_v59 = vld [vmem:[%s1987_s3 + $0xa8] sm:$0xff]   ;;  %v1589_v61 = vld [vmem:[%s1987_s3 + $0xb8] sm:$0xff]  }
 0x2dd   :  { %v877_v0 = vmax.f32 %v823_v60, 0.0  ;;  %v1588_v60 = vld [vmem:[%s1987_s3 + $0xb0] sm:$0xff]  }
 0x2de   :  { %v875_v3 = vmax.f32 %v815_v62, 0.0  ;;  %v1615_v62 = vmov 0.0  }
 0x2df   :  { %v908_v4 = vpack.c.bf16 %v877_v0, %v876_v63  ;;  %1531 = vmatprep.subr.bf16.mxu0 %v1615_v62  ;;  %1547 = vmatprep.mubr.msk.bf16.mxu0 %vm1616_vm2, %v1615_v62  ;;  %v935_v63 = vpop.permute.xlu0 %934  ;;  %v940_v0 = vpop.permute.xlu1 %939 }
 0x2e0   :  { %v907_v6 = vpack.c.bf16 %v875_v3, %v874_v2  ;;  %v1489_v7 = vpop.f32.mrb[20].mxu0 }
 0x2e1   :  { %v836_v8 = vadd.f32 %v1489_v7, %v682_v53  ;;  %v827_v9 = vpop.f32.mrb[21].mxu0 }
 0x2e2   :  { %v828_v10 = vadd.f32 %v827_v9, %v672_v51  ;;  %v1490_v11 = vpop.f32.mrb[22].mxu0  ;;  %1499 = vmatprep.subr.bf16.mxu1 %v907_v6 }
 0x2e3   :  { %v839_v12 = vadd.f32 %v1490_v11, %v687_v57  ;;  %v830_v13 = vpop.f32.mrb[23].mxu0  ;;  %1500 = vmatpush3.bf16.msra.mxu1 %v907_v6  ;;  %v880_v16 = vmax.f32 %v836_v8, 0.0  ;;  %v1585_v57 = vld [vmem:[%s1987_s3 + $0x98] sm:$0xff]   ;;  %v950_v2 = vpop.permute.xlu1 %949 }
 0x2e4   :  { %v831_v15 = vadd.f32 %v830_v13, %v677_v52  ;;  %1501 = vmatprep.subr.bf16.mxu1 %v908_v4  ;;  %v878_v19 = vmax.f32 %v828_v10, 0.0 }
 0x2e5   :  { %v881_v17 = vmax.f32 %v839_v12, 0.0 }
 0x2e6   :  { %v879_v20 = vmax.f32 %v831_v15, 0.0 }
 0x2e7   :  { %v910_v21 = vpack.c.bf16 %v881_v17, %v880_v16  ;;  %1502 = vmatpush3.bf16.msra.mxu1 %v908_v4  ;;  %v960_v4 = vpop.permute.xlu1 %959 }
 0x2e8   :  { %v909_v22 = vpack.c.bf16 %v879_v20, %v878_v19  ;;  %v1493_v23 = vpop.f32.mrb[24].mxu0 }
 0x2e9   :  { %v852_v24 = vadd.f32 %v1493_v23, %v702_v14  ;;  %v843_v25 = vpop.f32.mrb[25].mxu0 }
 0x2ea   :  { %v844_v27 = vadd.f32 %v843_v25, %v692_v1  ;;  %v1494_v28 = vpop.f32.mrb[26].mxu0  ;;  %1503 = vmatprep.subr.bf16.mxu1 %v909_v22  ;;  %v945_v1 = vpop.permute.xlu0 %944 }
 0x2eb   :  { %v855_v29 = vadd.f32 %v1494_v28, %v707_v18  ;;  %v846_v30 = vpop.f32.mrb[27].mxu0  ;;  %1504 = vmatpush3.bf16.msra.mxu1 %v909_v22  ;;  %v884_v33 = vmax.f32 %v852_v24, 0.0  ;;  %v970_v9 = vpop.permute.xlu1 %969 }
 0x2ec   :  { %v847_v32 = vadd.f32 %v846_v30, %v697_v5  ;;  %1505 = vmatprep.subr.bf16.mxu1 %v910_v21  ;;  %v882_v35 = vmax.f32 %v844_v27, 0.0 }
 0x2ed   :  { %v885_v34 = vmax.f32 %v855_v29, 0.0 }
 0x2ee   :  { %v883_v36 = vmax.f32 %v847_v32, 0.0  ;;  %v955_v3 = vpop.permute.xlu0 %954 }
 0x2ef   :  { %v912_v37 = vpack.c.bf16 %v885_v34, %v884_v33  ;;  %1506 = vmatpush3.bf16.msra.mxu1 %v910_v21  ;;  %v980_v21 = vpop.permute.xlu1 %979 }
 0x2f0   :  { %v911_v39 = vpack.c.bf16 %v883_v36, %v882_v35  ;;  %v1497_v40 = vpop.f32.mrb[28].mxu0 }
 0x2f1   :  { %v868_v41 = vadd.f32 %v1497_v40, %v722_v38  ;;  %v859_v42 = vpop.f32.mrb[29].mxu0 }
 0x2f2   :  { %v860_v44 = vadd.f32 %v859_v42, %v712_v26  ;;  %v1498_v45 = vpop.f32.mrb[30].mxu0  ;;  %1507 = vmatprep.subr.bf16.mxu1 %v911_v39  ;;  %v965_v5 = vpop.permute.xlu0 %964 }
 0x2f3   :  { %v871_v46 = vadd.f32 %v1498_v45, %v727_v43  ;;  %v862_v47 = vpop.f32.mrb[31].mxu0  ;;  %1508 = vmatpush3.bf16.msra.mxu1 %v911_v39  ;;  %v888_v49 = vmax.f32 %v868_v41, 0.0  ;;  %v990_v34 = vpop.permute.xlu1 %989 }
 0x2f4   :  { %v863_v48 = vadd.f32 %v862_v47, %v717_v31  ;;  %1509 = vmatprep.subr.bf16.mxu1 %v912_v37  ;;  %v886_v51 = vmax.f32 %v860_v44, 0.0 }
 0x2f5   :  { %v889_v50 = vmax.f32 %v871_v46, 0.0 }
 0x2f6   :  { %v887_v52 = vmax.f32 %v863_v48, 0.0  ;;  %v975_v17 = vpop.permute.xlu0 %974 }
 0x2f7   :  { %v914_v53 = vpack.c.bf16 %v889_v50, %v888_v49  ;;  %1510 = vmatpush3.bf16.msra.mxu1 %v912_v37  ;;  %v1000_v47 = vpop.permute.xlu1 %999 }
 0x2f8   :  { %v913_v54 = vpack.c.bf16 %v887_v52, %v886_v51 }
 0x2fa   :  { %1511 = vmatprep.subr.bf16.mxu1 %v913_v54  ;;  %v985_v30 = vpop.permute.xlu0 %984 }
 0x2fb   :  { %1512 = vmatpush3.bf16.msra.mxu1 %v913_v54 }
 0x2fc   :  { %1513 = vmatprep.subr.bf16.mxu1 %v914_v53 }
 0x2fe   :  { %v995_v42 = vpop.permute.xlu0 %994 }
 0x2ff   :  { %1514 = vmatpush3.bf16.msra.mxu1 %v914_v53 }
 0x302   :  { %1516 = vmatmul.mubr.bf16.vlgmr.msra.gmra.mrb[16].mxu1 %v1583_v55  ;;  %v1005_v54 = vpop.permute.xlu0 %1004 }
 0x303   :  { %1519 = vmatprep.mubr.bf16.mxu1 %v1584_v56 }
 0x30a   :  { %1520 = vmatmul.mubr.bf16.gmra.mrb[20].mxu1 %v1585_v57 }
 0x30b   :  { %1523 = vmatprep.mubr.bf16.mxu1 %v1586_v58 }
 0x312   :  { %1524 = vmatmul.mubr.bf16.gmra.mrb[24].mxu1 %v1587_v59  ;;  %v1010_v59 = vpop.permute.xlu1 %1009 }
 0x313   :  { %1527 = vmatprep.mubr.bf16.mxu1 %v1588_v60 }
 0x31a   :  { %1528 = vmatmul.mubr.bf16.gmra.mrb[28].mxu1 %v1589_v61 }
 0x3d5   :  { %v1517_v6 = vpop.f32.mrb[16].mxu1 }
 0x3d6   :  { %v1103_v7 = vadd.f32 %v1517_v6, %v945_v1  ;;  %v1094_v8 = vpop.f32.mrb[17].mxu1 }
 0x3d7   :  { %v1095_v10 = vadd.f32 %v1094_v8, %v935_v63  ;;  %v1518_v11 = vpop.f32.mrb[18].mxu1  ;;  %v1173_v8 = vld [vmem:[%s1989_s5] sm:$0x1] }
 0x3d8   :  { %v1106_v12 = vadd.f32 %v1518_v11, %v950_v2  ;;  %v1097_v13 = vpop.f32.mrb[19].mxu1  ;;  %v1159_v15 = vmax.f32 %v1103_v7, 0.0 }
 0x3d9   :  { %v1098_v14 = vadd.f32 %v1097_v13, %v940_v0  ;;  %v1157_v18 = vmax.f32 %v1095_v10, 0.0 }
 0x3da   :  { %v1160_v16 = vmax.f32 %v1106_v12, 0.0  ;;  %v1186_v12 = vpop.permute.xlu0 %1185 }
 0x3db   :  { %v1158_v19 = vmax.f32 %v1098_v14, 0.0 }
 0x3dc   :  { %v1175_v20 = vpack.c.bf16 %v1160_v16, %v1159_v15 }
 0x3dd   :  { %v1174_v22 = vpack.c.bf16 %v1158_v19, %v1157_v18  ;;  %v1521_v23 = vpop.f32.mrb[20].mxu1 }
 0x3de   :  { %v1119_v24 = vadd.f32 %v1521_v23, %v965_v5  ;;  %v1110_v25 = vpop.f32.mrb[21].mxu1 }
 0x3df   :  { %v1111_v26 = vadd.f32 %v1110_v25, %v955_v3  ;;  %v1522_v27 = vpop.f32.mrb[22].mxu1  ;;  %1532 = vmatpush3.bf16.msra.mxu0 %v1174_v22 }
 0x3e0   :  { %v1122_v28 = vadd.f32 %v1522_v27, %v970_v9  ;;  %v1113_v29 = vpop.f32.mrb[23].mxu1  ;;  %1533 = vmatprep.subr.bf16.mxu0 %v1615_v62  ;;  %v1163_v32 = vmax.f32 %v1119_v24, 0.0  ;;  %v1188_v9 = vlaneseq }
 0x3e1   :  { %v1114_v31 = vadd.f32 %v1113_v29, %v960_v4  ;;  %v1161_v35 = vmax.f32 %v1111_v26, 0.0 }
 0x3e2   :  { %v1164_v33 = vmax.f32 %v1122_v28, 0.0  ;;  %v1189_v10 = vshrl.u32 %v1188_v9, 7 }
 0x3e3   :  { %v1162_v36 = vmax.f32 %v1114_v31, 0.0  ;;  %1534 = vmatpush3.bf16.msra.mxu0 %v1175_v20 }
 0x3e4   :  { %v1177_v37 = vpack.c.bf16 %v1164_v33, %v1163_v32  ;;  %1535 = vmatprep.subr.bf16.mxu0 %v1615_v62  ;;  %v1190_v11 = vsub.s32 0, %v1189_v10 }
 0x3e5   :  { %v1176_v38 = vpack.c.bf16 %v1162_v36, %v1161_v35  ;;  %v1525_v39 = vpop.f32.mrb[24].mxu1 }
 0x3e6   :  { %v1135_v40 = vadd.f32 %v1525_v39, %v985_v30  ;;  %v1126_v41 = vpop.f32.mrb[25].mxu1  ;;  %v1191_v13 = vrot.slane %v1186_v12, %v1190_v11 }
 0x3e7   :  { %v1127_v43 = vadd.f32 %v1126_v41, %v975_v17  ;;  %v1526_v44 = vpop.f32.mrb[26].mxu1  ;;  %1536 = vmatpush3.bf16.msra.mxu0 %v1176_v38 }
 0x3e8   :  { %v1138_v45 = vadd.f32 %v1526_v44, %v990_v34  ;;  %v1129_v46 = vpop.f32.mrb[27].mxu1  ;;  %1537 = vmatprep.subr.bf16.mxu0 %v1615_v62  ;;  %v1167_v49 = vmax.f32 %v1135_v40, 0.0 }
 0x3e9   :  { %v1130_v48 = vadd.f32 %v1129_v46, %v980_v21  ;;  %v1165_v51 = vmax.f32 %v1127_v43, 0.0 }
 0x3ea   :  { %v1168_v50 = vmax.f32 %v1138_v45, 0.0 }
 0x3eb   :  { %v1166_v52 = vmax.f32 %v1130_v48, 0.0  ;;  %1538 = vmatpush3.bf16.msra.mxu0 %v1177_v37 }
 0x3ec   :  { %v1179_v53 = vpack.c.bf16 %v1168_v50, %v1167_v49  ;;  %1539 = vmatprep.subr.bf16.mxu0 %v1615_v62 }
 0x3ed   :  { %v1178_v55 = vpack.c.bf16 %v1166_v52, %v1165_v51  ;;  %v1529_v56 = vpop.f32.mrb[28].mxu1 }
 0x3ee   :  { %v1151_v57 = vadd.f32 %v1529_v56, %v1005_v54  ;;  %v1142_v58 = vpop.f32.mrb[29].mxu1 }
 0x3ef   :  { %v1143_v60 = vadd.f32 %v1142_v58, %v995_v42  ;;  %v1530_v61 = vpop.f32.mrb[30].mxu1  ;;  %1540 = vmatpush3.bf16.msra.mxu0 %v1178_v55 }
 0x3f0   :  { %v1154_v63 = vadd.f32 %v1530_v61, %v1010_v59  ;;  %v1145_v0 = vpop.f32.mrb[31].mxu1  ;;  %1541 = vmatprep.subr.bf16.mxu0 %v1615_v62  ;;  %v1171_v2 = vmax.f32 %v1151_v57, 0.0 }
 0x3f1   :  { %v1146_v1 = vadd.f32 %v1145_v0, %v1000_v47  ;;  %v1169_v4 = vmax.f32 %v1143_v60, 0.0 }
 0x3f2   :  { %v1172_v3 = vmax.f32 %v1154_v63, 0.0 }
 0x3f3   :  { %v1170_v5 = vmax.f32 %v1146_v1, 0.0  ;;  %1542 = vmatpush3.bf16.msra.mxu0 %v1179_v53 }
 0x3f4   :  { %v1181_v6 = vpack.c.bf16 %v1172_v3, %v1171_v2  ;;  %1543 = vmatprep.subr.bf16.mxu0 %v1615_v62 }
 0x3f5   :  { %v1180_v7 = vpack.c.bf16 %v1170_v5, %v1169_v4 }
 0x3f7   :  { %1544 = vmatpush3.bf16.msra.mxu0 %v1180_v7 }
 0x3f8   :  { %1545 = vmatprep.subr.bf16.mxu0 %v1615_v62 }
 0x3fb   :  { %1546 = vmatpush3.bf16.msra.mxu0 %v1181_v6 }
 0x3fe   :  { %1548 = vmatmul.mubr.bf16.vlgmr.msra.gmra.mrb[32].mxu0 %v1173_v8 }
 0x4d1   :  { %v1226_v14 = vpop.f32.mrb[32].mxu0 }
 0x4d2   :  { %v1227_v15 = vadd.f32 %v1226_v14, %v1191_v13  ;;  %v1549_v16 = vpop.f32.mrb[33].mxu0 }
 0x4d3   :  { %v1229_v17 = vpop.f32.mrb[34].mxu0 }
 0x4d4   :  { %1232 = vst [vmem:[#allocation3] sm:$0x1] %v1227_v15  ;;  %v1550_v62 = vpop.f32.mrb[35].mxu0 }
 0x4d5   :  { %1601 = shalt.err (!%p1598_p4)
}
 0x4d6   :  { %s1602_s0 = scalar_lea.hbm %s1991_s7, 16 }
 0x4d7   :  { %p1603_p5 = scmp.ne.s32.totalorder %s1991_s7, %s1602_s0  ;;  %p1606_p6 = scmp.lt.u32.totalorder %s1602_s0, %s1991_s7 }
 0x4d9   :  { %p1608_p7 = pnand %p1606_p6, %p1603_p5 }
 0x4db   :  { %1611 = shalt.err (!%p1608_p7)
}
 0x4dc   :  { %1242 = dma.vmem_to_hbm [thread:$0]  %s1240_s6, 16, %s1991_s7, [#allocation4]  }
 0x4dd   :  { %1612 = dma.done.wait [#allocation4], 16  }
 0x4de   :  { %1613 = vsyncadd [#allocation4], 4294967280 }
 0x4df   :  { %1246 = vsyncpa [#allocation4], 1 }

</bundles_post_ra>
